<compile_context>
chip_gen: v6e
topology: v6e:2x2x1
jax: 0.10.0
libtpu: 0.0.40
codegen_flags: <defaults>
</compile_context>

<pallas_src>
import functools

import jax
import jax.numpy as jnp
from jax.experimental import pallas as pl
from jax.experimental.pallas import tpu as pltpu


# Bit-exact duplicate structure of the 20 PyTorch outputs:
#   b_I_a == a_I_b == a_I_b_b == b_I_a_a        (min commutative + idempotent)
#   b_U_a == a_U_b                              (add commutative)
#   a_S_a_I_b == a_S_b_I_a,  b_S_b_I_a == b_S_a_I_b
# -> 14 unique latents are decoded; this maps output index -> unique row.
_UNIQUE = 14
_OUTPUT_TO_UNIQUE = (0, 1, 2, 3, 4, 4, 5, 5, 6, 7, 5, 5, 8, 9, 10, 11, 10, 11, 12, 13)


def _mlp(x, params):
    """Linear->ReLU stack; no ReLU after the last layer. Runs on MXU/VPU in VMEM."""
    n = len(params)
    for i, (w, bcol) in enumerate(params):
        x = jnp.dot(x, w, preferred_element_type=jnp.float32) + bcol
        if i < n - 1:
            x = jnp.maximum(x, 0.0)
    return x


def _fused_kernel(*refs, n_enc, n_dec, batch):
    """Entire SetOpsAEModule forward in one kernel invocation.

    refs = (a, b, enc_w0, enc_b0, ..., dec_w0, dec_b0, ..., out)
    """
    a_ref, b_ref = refs[0], refs[1]
    p = 2
    enc = [(refs[p + 2 * i][...], refs[p + 2 * i + 1][...]) for i in range(n_enc)]
    p += 2 * n_enc
    dec = [(refs[p + 2 * i][...], refs[p + 2 * i + 1][...]) for i in range(n_dec)]
    out_ref = refs[-1]

    # Batched encoder: one (2B, in_dim) matmul chain instead of two (B, in_dim).
    ab = jnp.concatenate([a_ref[...], b_ref[...]], axis=0)
    enc_out = _mlp(ab, enc)                      # (2B, E) in VMEM
    a = enc_out[:batch]
    b = enc_out[batch:]

    # Elementwise set operations: one VPU pass, only the unique latents kept.
    sub = lambda u, v: jnp.maximum(u - v, 0.0)   # subrelu
    a_I_b = jnp.minimum(a, b)                    # == b_I_a == a_I_b_b == b_I_a_a
    a_U_b = a + b                                # == b_U_a
    a_S_b = sub(a, b)
    b_S_a = sub(b, a)
    a_S_b_b = sub(a_S_b, b)
    b_S_a_a = sub(b_S_a, a)
    a_U_b_b = a_U_b + b
    b_U_a_a = a_U_b + a
    a_S_b_I_a = sub(a, a_I_b)                    # == a_S_a_I_b
    b_S_a_I_b = sub(b, a_I_b)                    # == b_S_b_I_a
    out_a = a_S_b_I_a + a_I_b                    # kept literal (not reduced to a)
    out_b = b_S_a_I_b + a_I_b

    uniques = [out_a, out_b, a_S_b, b_S_a, a_U_b, a_I_b, a_S_b_b, b_S_a_a,
               a_U_b_b, b_U_a_a, a_S_b_I_a, b_S_a_I_b, a, b]
    stacked = jnp.concatenate(uniques, axis=0)   # (14*B, E), never touches HBM

    # One batched decoder matmul chain over all unique rows; single dense store.
    dec_out = _mlp(stacked, dec)                 # (14*B, input_dim)
    out_ref[...] = dec_out.astype(out_ref.dtype)


def setops_ae_forward(a, b, enc_params, dec_params):
    """Returns the module's 20 decoded outputs, each (batch, input_dim)."""
    batch = a.shape[0]
    out_dim = dec_params[-1][0].shape[1]
    flat = []
    for w, bcol in list(enc_params) + list(dec_params):
        flat += [w, bcol]

    kernel = functools.partial(_fused_kernel, n_enc=len(enc_params),
                               n_dec=len(dec_params), batch=batch)
    dec_out = pl.pallas_call(
        kernel,
        out_shape=jax.ShapeDtypeStruct((_UNIQUE * batch, out_dim), jnp.float32),
        in_specs=[pl.BlockSpec(memory_space=pltpu.MemorySpace.VMEM)] * (2 + len(flat)),
        out_specs=pl.BlockSpec(memory_space=pltpu.MemorySpace.VMEM),
    )(a, b, *flat)

    # Fan the single lane-dense slab back out to the module's 20 outputs.
    dec_out = dec_out.reshape(_UNIQUE, batch, out_dim)
    return [dec_out[i] for i in _OUTPUT_TO_UNIQUE]


def init_mlp_params(key, input_dim, latent_dim, output_dim, layers_num):
    dims = [input_dim] + [latent_dim] * (layers_num + 1) + [output_dim]
    params = []
    for i in range(len(dims) - 1):
        key, kw, kb = jax.random.split(key, 3)
        scale = 1.0 / jnp.sqrt(jnp.float32(dims[i]))
        w = jax.random.uniform(kw, (dims[i], dims[i + 1]), jnp.float32,
                               minval=-scale, maxval=scale)
        bcol = jax.random.uniform(kb, (1, dims[i + 1]), jnp.float32,
                                  minval=-scale, maxval=scale)
        params.append((w, bcol))
    return params


if __name__ == "__main__":
    input_dim, latent_dim, encoder_dim, layers_num = 32, 64, 16, 2
    batch = 2

    key = jax.random.PRNGKey(0)
    k_a, k_b, k_enc, k_dec = jax.random.split(key, 4)
    a = jax.random.normal(k_a, (batch, input_dim), jnp.float32)
    b = jax.random.normal(k_b, (batch, input_dim), jnp.float32)

    enc_params = init_mlp_params(k_enc, input_dim, latent_dim, encoder_dim, layers_num)
    dec_params = init_mlp_params(k_dec, encoder_dim, latent_dim, input_dim, layers_num)

    outputs = setops_ae_forward(a, b, enc_params, dec_params)
    outputs = jax.block_until_ready(outputs)

    # Pure-JAX reference of the full (un-deduplicated) forward pass.
    def ref_mlp(x, params):
        n = len(params)
        for i, (w, bcol) in enumerate(params):
            x = x @ w + bcol
            if i < n - 1:
                x = jnp.maximum(x, 0.0)
        return x

    ae, be = ref_mlp(a, enc_params), ref_mlp(b, enc_params)
    sub = lambda x, y: jnp.maximum(x - y, 0.0)
    aSb, bSa = sub(ae, be), sub(be, ae)
    aIb, bIa = jnp.minimum(ae, be), jnp.minimum(be, ae)
    aUb, bUa = ae + be, be + ae
    ref_list = [sub(ae, bIa) + aIb, sub(be, aIb) + bIa, aSb, bSa, aUb, bUa,
                aIb, bIa, sub(aSb, be), sub(bSa, ae), jnp.minimum(aIb, be),
                jnp.minimum(bIa, ae), aUb + be, bUa + ae, sub(ae, bIa),
                sub(be, aIb), sub(ae, aIb), sub(be, bIa), ae, be]
    ref_out = [ref_mlp(o, dec_params) for o in ref_list]

    assert len(outputs) == 20
    for got, want in zip(outputs, ref_out):
        assert got.shape == (batch, input_dim)
        assert jnp.allclose(got, want, atol=1e-4, rtol=1e-4)

    print("KERNEL_OK")
</pallas_src>

<mosaic_0001>
module attributes {stable_mosaic.version = 11 : i64} {
  func.func @_fused_kernel(%arg0: memref<2x32xf32, #tpu.memory_space<vmem>>, %arg1: memref<2x32xf32, #tpu.memory_space<vmem>>, %arg2: memref<32x64xf32, #tpu.memory_space<vmem>>, %arg3: memref<1x64xf32, #tpu.memory_space<vmem>>, %arg4: memref<64x64xf32, #tpu.memory_space<vmem>>, %arg5: memref<1x64xf32, #tpu.memory_space<vmem>>, %arg6: memref<64x64xf32, #tpu.memory_space<vmem>>, %arg7: memref<1x64xf32, #tpu.memory_space<vmem>>, %arg8: memref<64x16xf32, #tpu.memory_space<vmem>>, %arg9: memref<1x16xf32, #tpu.memory_space<vmem>>, %arg10: memref<16x64xf32, #tpu.memory_space<vmem>>, %arg11: memref<1x64xf32, #tpu.memory_space<vmem>>, %arg12: memref<64x64xf32, #tpu.memory_space<vmem>>, %arg13: memref<1x64xf32, #tpu.memory_space<vmem>>, %arg14: memref<64x64xf32, #tpu.memory_space<vmem>>, %arg15: memref<1x64xf32, #tpu.memory_space<vmem>>, %arg16: memref<64x32xf32, #tpu.memory_space<vmem>>, %arg17: memref<1x32xf32, #tpu.memory_space<vmem>>, %arg18: memref<28x32xf32, #tpu.memory_space<vmem>>) attributes {dimension_semantics = [], scalar_prefetch = 0 : i64, scratch_operands = 0 : i64, tpu.core_type = #tpu.core_type<tc>} {
    %c0 = arith.constant 0 : index
    %c0_0 = arith.constant 0 : index
    %0 = vector.load %arg2[%c0, %c0_0] : memref<32x64xf32, #tpu.memory_space<vmem>>, vector<32x64xf32>
    %c0_1 = arith.constant 0 : index
    %c0_2 = arith.constant 0 : index
    %1 = vector.load %arg3[%c0_1, %c0_2] : memref<1x64xf32, #tpu.memory_space<vmem>>, vector<1x64xf32>
    %c0_3 = arith.constant 0 : index
    %c0_4 = arith.constant 0 : index
    %2 = vector.load %arg4[%c0_3, %c0_4] : memref<64x64xf32, #tpu.memory_space<vmem>>, vector<64x64xf32>
    %c0_5 = arith.constant 0 : index
    %c0_6 = arith.constant 0 : index
    %3 = vector.load %arg5[%c0_5, %c0_6] : memref<1x64xf32, #tpu.memory_space<vmem>>, vector<1x64xf32>
    %c0_7 = arith.constant 0 : index
    %c0_8 = arith.constant 0 : index
    %4 = vector.load %arg6[%c0_7, %c0_8] : memref<64x64xf32, #tpu.memory_space<vmem>>, vector<64x64xf32>
    %c0_9 = arith.constant 0 : index
    %c0_10 = arith.constant 0 : index
    %5 = vector.load %arg7[%c0_9, %c0_10] : memref<1x64xf32, #tpu.memory_space<vmem>>, vector<1x64xf32>
    %c0_11 = arith.constant 0 : index
    %c0_12 = arith.constant 0 : index
    %6 = vector.load %arg8[%c0_11, %c0_12] : memref<64x16xf32, #tpu.memory_space<vmem>>, vector<64x16xf32>
    %c0_13 = arith.constant 0 : index
    %c0_14 = arith.constant 0 : index
    %7 = vector.load %arg9[%c0_13, %c0_14] : memref<1x16xf32, #tpu.memory_space<vmem>>, vector<1x16xf32>
    %c0_15 = arith.constant 0 : index
    %c0_16 = arith.constant 0 : index
    %8 = vector.load %arg10[%c0_15, %c0_16] : memref<16x64xf32, #tpu.memory_space<vmem>>, vector<16x64xf32>
    %c0_17 = arith.constant 0 : index
    %c0_18 = arith.constant 0 : index
    %9 = vector.load %arg11[%c0_17, %c0_18] : memref<1x64xf32, #tpu.memory_space<vmem>>, vector<1x64xf32>
    %c0_19 = arith.constant 0 : index
    %c0_20 = arith.constant 0 : index
    %10 = vector.load %arg12[%c0_19, %c0_20] : memref<64x64xf32, #tpu.memory_space<vmem>>, vector<64x64xf32>
    %c0_21 = arith.constant 0 : index
    %c0_22 = arith.constant 0 : index
    %11 = vector.load %arg13[%c0_21, %c0_22] : memref<1x64xf32, #tpu.memory_space<vmem>>, vector<1x64xf32>
    %c0_23 = arith.constant 0 : index
    %c0_24 = arith.constant 0 : index
    %12 = vector.load %arg14[%c0_23, %c0_24] : memref<64x64xf32, #tpu.memory_space<vmem>>, vector<64x64xf32>
    %c0_25 = arith.constant 0 : index
    %c0_26 = arith.constant 0 : index
    %13 = vector.load %arg15[%c0_25, %c0_26] : memref<1x64xf32, #tpu.memory_space<vmem>>, vector<1x64xf32>
    %c0_27 = arith.constant 0 : index
    %c0_28 = arith.constant 0 : index
    %14 = vector.load %arg16[%c0_27, %c0_28] : memref<64x32xf32, #tpu.memory_space<vmem>>, vector<64x32xf32>
    %c0_29 = arith.constant 0 : index
    %c0_30 = arith.constant 0 : index
    %15 = vector.load %arg17[%c0_29, %c0_30] : memref<1x32xf32, #tpu.memory_space<vmem>>, vector<1x32xf32>
    %c0_31 = arith.constant 0 : index
    %c0_32 = arith.constant 0 : index
    %16 = vector.load %arg0[%c0_31, %c0_32] : memref<2x32xf32, #tpu.memory_space<vmem>>, vector<2x32xf32>
    %c0_33 = arith.constant 0 : index
    %c0_34 = arith.constant 0 : index
    %17 = vector.load %arg1[%c0_33, %c0_34] : memref<2x32xf32, #tpu.memory_space<vmem>>, vector<2x32xf32>
    %18 = tpu.concatenate %16, %17 in 0 : vector<2x32xf32>, vector<2x32xf32> -> vector<4x32xf32>
    %cst = arith.constant dense<0.000000e+00> : vector<4x64xf32>
    %19 = tpu.matmul %18, %0, %cst {dimension_numbers = #tpu.dot_dimension_numbers<[1], [0], [0], [1], [0, 0, 1, 1], [], []>} : vector<4x32xf32>, vector<32x64xf32>, vector<4x64xf32> -> vector<4x64xf32>
    %20 = vector.broadcast %1 : vector<1x64xf32> to vector<4x64xf32>
    %21 = arith.addf %19, %20 : vector<4x64xf32>
    %cst_35 = arith.constant 0.000000e+00 : f32
    %22 = vector.broadcast %cst_35 : f32 to vector<4x64xf32>
    %23 = arith.maximumf %21, %22 : vector<4x64xf32>
    %cst_36 = arith.constant dense<0.000000e+00> : vector<4x64xf32>
    %24 = tpu.matmul %23, %2, %cst_36 {dimension_numbers = #tpu.dot_dimension_numbers<[1], [0], [0], [1], [0, 0, 1, 1], [], []>} : vector<4x64xf32>, vector<64x64xf32>, vector<4x64xf32> -> vector<4x64xf32>
    %25 = vector.broadcast %3 : vector<1x64xf32> to vector<4x64xf32>
    %26 = arith.addf %24, %25 : vector<4x64xf32>
    %cst_37 = arith.constant 0.000000e+00 : f32
    %27 = vector.broadcast %cst_37 : f32 to vector<4x64xf32>
    %28 = arith.maximumf %26, %27 : vector<4x64xf32>
    %cst_38 = arith.constant dense<0.000000e+00> : vector<4x64xf32>
    %29 = tpu.matmul %28, %4, %cst_38 {dimension_numbers = #tpu.dot_dimension_numbers<[1], [0], [0], [1], [0, 0, 1, 1], [], []>} : vector<4x64xf32>, vector<64x64xf32>, vector<4x64xf32> -> vector<4x64xf32>
    %30 = vector.broadcast %5 : vector<1x64xf32> to vector<4x64xf32>
    %31 = arith.addf %29, %30 : vector<4x64xf32>
    %cst_39 = arith.constant 0.000000e+00 : f32
    %32 = vector.broadcast %cst_39 : f32 to vector<4x64xf32>
    %33 = arith.maximumf %31, %32 : vector<4x64xf32>
    %cst_40 = arith.constant dense<0.000000e+00> : vector<4x16xf32>
    %34 = tpu.matmul %33, %6, %cst_40 {dimension_numbers = #tpu.dot_dimension_numbers<[1], [0], [0], [1], [0, 0, 1, 1], [], []>} : vector<4x64xf32>, vector<64x16xf32>, vector<4x16xf32> -> vector<4x16xf32>
    %35 = vector.broadcast %7 : vector<1x16xf32> to vector<4x16xf32>
    %36 = arith.addf %34, %35 : vector<4x16xf32>
    %37 = vector.extract_strided_slice %36 {offsets = [0, 0], sizes = [2, 16], strides = [1, 1]} : vector<4x16xf32> to vector<2x16xf32>
    %38 = vector.extract_strided_slice %36 {offsets = [2, 0], sizes = [2, 16], strides = [1, 1]} : vector<4x16xf32> to vector<2x16xf32>
    %39 = arith.minimumf %37, %38 : vector<2x16xf32>
    %40 = arith.addf %37, %38 : vector<2x16xf32>
    %41 = arith.subf %37, %38 : vector<2x16xf32>
    %cst_41 = arith.constant 0.000000e+00 : f32
    %42 = vector.broadcast %cst_41 : f32 to vector<2x16xf32>
    %43 = arith.maximumf %41, %42 : vector<2x16xf32>
    %44 = arith.subf %38, %37 : vector<2x16xf32>
    %cst_42 = arith.constant 0.000000e+00 : f32
    %45 = vector.broadcast %cst_42 : f32 to vector<2x16xf32>
    %46 = arith.maximumf %44, %45 : vector<2x16xf32>
    %47 = arith.subf %43, %38 : vector<2x16xf32>
    %cst_43 = arith.constant 0.000000e+00 : f32
    %48 = vector.broadcast %cst_43 : f32 to vector<2x16xf32>
    %49 = arith.maximumf %47, %48 : vector<2x16xf32>
    %50 = arith.subf %46, %37 : vector<2x16xf32>
    %cst_44 = arith.constant 0.000000e+00 : f32
    %51 = vector.broadcast %cst_44 : f32 to vector<2x16xf32>
    %52 = arith.maximumf %50, %51 : vector<2x16xf32>
    %53 = arith.addf %40, %38 : vector<2x16xf32>
    %54 = arith.addf %40, %37 : vector<2x16xf32>
    %55 = arith.subf %37, %39 : vector<2x16xf32>
    %cst_45 = arith.constant 0.000000e+00 : f32
    %56 = vector.broadcast %cst_45 : f32 to vector<2x16xf32>
    %57 = arith.maximumf %55, %56 : vector<2x16xf32>
    %58 = arith.subf %38, %39 : vector<2x16xf32>
    %cst_46 = arith.constant 0.000000e+00 : f32
    %59 = vector.broadcast %cst_46 : f32 to vector<2x16xf32>
    %60 = arith.maximumf %58, %59 : vector<2x16xf32>
    %61 = arith.addf %57, %39 : vector<2x16xf32>
    %62 = arith.addf %60, %39 : vector<2x16xf32>
    %63 = tpu.concatenate %61, %62, %43, %46, %40, %39, %49, %52, %53, %54, %57, %60, %37, %38 in 0 : vector<2x16xf32>, vector<2x16xf32>, vector<2x16xf32>, vector<2x16xf32>, vector<2x16xf32>, vector<2x16xf32>, vector<2x16xf32>, vector<2x16xf32>, vector<2x16xf32>, vector<2x16xf32>, vector<2x16xf32>, vector<2x16xf32>, vector<2x16xf32>, vector<2x16xf32> -> vector<28x16xf32>
    %cst_47 = arith.constant dense<0.000000e+00> : vector<28x64xf32>
    %64 = tpu.matmul %63, %8, %cst_47 {dimension_numbers = #tpu.dot_dimension_numbers<[1], [0], [0], [1], [0, 0, 1, 1], [], []>} : vector<28x16xf32>, vector<16x64xf32>, vector<28x64xf32> -> vector<28x64xf32>
    %65 = vector.broadcast %9 : vector<1x64xf32> to vector<28x64xf32>
    %66 = arith.addf %64, %65 : vector<28x64xf32>
    %cst_48 = arith.constant 0.000000e+00 : f32
    %67 = vector.broadcast %cst_48 : f32 to vector<28x64xf32>
    %68 = arith.maximumf %66, %67 : vector<28x64xf32>
    %cst_49 = arith.constant dense<0.000000e+00> : vector<28x64xf32>
    %69 = tpu.matmul %68, %10, %cst_49 {dimension_numbers = #tpu.dot_dimension_numbers<[1], [0], [0], [1], [0, 0, 1, 1], [], []>} : vector<28x64xf32>, vector<64x64xf32>, vector<28x64xf32> -> vector<28x64xf32>
    %70 = vector.broadcast %11 : vector<1x64xf32> to vector<28x64xf32>
    %71 = arith.addf %69, %70 : vector<28x64xf32>
    %cst_50 = arith.constant 0.000000e+00 : f32
    %72 = vector.broadcast %cst_50 : f32 to vector<28x64xf32>
    %73 = arith.maximumf %71, %72 : vector<28x64xf32>
    %cst_51 = arith.constant dense<0.000000e+00> : vector<28x64xf32>
    %74 = tpu.matmul %73, %12, %cst_51 {dimension_numbers = #tpu.dot_dimension_numbers<[1], [0], [0], [1], [0, 0, 1, 1], [], []>} : vector<28x64xf32>, vector<64x64xf32>, vector<28x64xf32> -> vector<28x64xf32>
    %75 = vector.broadcast %13 : vector<1x64xf32> to vector<28x64xf32>
    %76 = arith.addf %74, %75 : vector<28x64xf32>
    %cst_52 = arith.constant 0.000000e+00 : f32
    %77 = vector.broadcast %cst_52 : f32 to vector<28x64xf32>
    %78 = arith.maximumf %76, %77 : vector<28x64xf32>
    %cst_53 = arith.constant dense<0.000000e+00> : vector<28x32xf32>
    %79 = tpu.matmul %78, %14, %cst_53 {dimension_numbers = #tpu.dot_dimension_numbers<[1], [0], [0], [1], [0, 0, 1, 1], [], []>} : vector<28x64xf32>, vector<64x32xf32>, vector<28x32xf32> -> vector<28x32xf32>
    %80 = vector.broadcast %15 : vector<1x32xf32> to vector<28x32xf32>
    %81 = arith.addf %79, %80 : vector<28x32xf32>
    %c0_54 = arith.constant 0 : index
    %c0_55 = arith.constant 0 : index
    %82 = vector.load %arg18[%c0_54, %c0_55] : memref<28x32xf32, #tpu.memory_space<vmem>>, vector<28x32xf32>
    tpu.vector_store %arg18[%c0_54, %c0_55], %81 {strides = array<i32>} : memref<28x32xf32, #tpu.memory_space<vmem>>, vector<28x32xf32>,
    return
  }
}

</mosaic_0001>

<bundles_post_ra>
// kernel: tpu_custom_call.1
= control target key start
LH: loop header
LB: loop body
LE: loop exit
PB: predicated region body
PF: predicated region fallthrough
CT: control target
= control target key end

     0   :  { %s1892_s0 = inlined_call_operand.vmem [shape: f32[2,32], index: 0, kind: input, shape index: {}]   ;;  %s1893_s1 = inlined_call_operand.hbm [shape: f32[2,32], index: 1, kind: input, shape index: {}]   ;;  %s1894_s2 = inlined_call_operand.hbm [shape: f32[32,64], index: 2, kind: input, shape index: {}]   ;;  %s1895_s3 = inlined_call_operand.hbm [shape: f32[1,64], index: 3, kind: input, shape index: {}]   ;;  %s1896_s4 = inlined_call_operand.vmem [shape: f32[64,64], index: 4, kind: input, shape index: {}]   ;;  %s1897_s5 = inlined_call_operand.hbm [shape: f32[1,64], index: 5, kind: input, shape index: {}]   ;;  %s1898_s6 = inlined_call_operand.vmem [shape: f32[64,64], index: 6, kind: input, shape index: {}]   ;;  %s1899_s7 = inlined_call_operand.hbm [shape: f32[1,64], index: 7, kind: input, shape index: {}]   ;;  %s1900_s8 = inlined_call_operand.vmem [shape: f32[64,16], index: 8, kind: input, shape index: {}]   ;;  %s1901_s9 = inlined_call_operand.hbm [shape: f32[1,16], index: 9, kind: input, shape index: {}]   ;;  %s1902_s10 = inlined_call_operand.hbm [shape: f32[16,64], index: 10, kind: input, shape index: {}]   ;;  %s1903_s11 = inlined_call_operand.hbm [shape: f32[1,64], index: 11, kind: input, shape index: {}]   ;;  %s1904_s12 = inlined_call_operand.vmem [shape: f32[64,64], index: 12, kind: input, shape index: {}]   ;;  %s1905_s13 = inlined_call_operand.vmem [shape: f32[1,64], index: 13, kind: input, shape index: {}]   ;;  %s1906_s14 = inlined_call_operand.hbm [shape: f32[64,64], index: 14, kind: input, shape index: {}]   ;;  %s1907_s15 = inlined_call_operand.vmem [shape: f32[1,64], index: 15, kind: input, shape index: {}]   ;;  %s1908_s16 = inlined_call_operand.vmem [shape: f32[64,32], index: 16, kind: input, shape index: {}]   ;;  %s1909_s17 = inlined_call_operand.vmem [shape: f32[1,32], index: 17, kind: input, shape index: {}]   ;;  %s1910_s18 = inlined_call_operand.hbm [shape: f32[28,32], index: 18, kind: output, shape index: {}]  }
   0x1   :  { %1911 = sst [smem:[#allocation24_spill]] %s1892_s0 }
   0x2   :  { %1912 = sst [smem:[#allocation25_spill]] %s1893_s1 }
   0x3   :  { %1913 = sst [smem:[#allocation26_spill]] %s1894_s2 }
   0x4   :  { %23 = vsyncpa [#allocation3], 0 }
   0x5   :  { %24 = vsyncpa [#allocation6], 0 }
   0x6   :  { %25 = vsyncpa [#allocation9], 0 }
   0x7   :  { %26 = vsyncpa [#allocation12], 0 }
   0x8   :  { %27 = vsyncpa [#allocation15], 0 }
   0x9   :  { %28 = vsyncpa [#allocation4], 0  ;;  %s1540_s27 = smov [#allocation5]  }
   0xa   :  { %s46_s28 = sshll.u32 %s1540_s27, 4  ;;  %s47_s28 = int_to_ptr.vmem [resolvable:$true] %s46_s28 }
   0xb   :  { %s1336_s29 = scalar_lea.vmem %s47_s28, 512  ;;  %p1341_p1 = scmp.lt.s32.totalorder %s47_s28, %s47_s28 }
   0xc   :  { %p1337_p0 = scmp.ne.s32.totalorder %s47_s28, %s1336_s29  ;;  %p1342_p2 = scmp.lt.s32.totalorder %s1336_s29, %s1336_s29 }
   0xe   :  { %p1343_p3 = por %p1342_p2, %p1341_p1 }
  0x10   :  { %p1344_p4 = pnand %p1343_p3, %p1337_p0 }
  0x12   :  { %1347 = shalt.err (!%p1344_p4)
}
  0x13   :  { %s1541_s30 = smov 128   ;;  %s1542_s0 = smov 8  }
  0x14   :  { %s1914_s20 = sld [smem:[#allocation26_spill]]  ;;  %s1543_s21 = smov [#allocation8]  }
  0x15   :  { %s71_s22 = sshll.u32 %s1543_s21, 4  ;;  %s1544_s2 = smov [#allocation11]   ;;  %s72_s22 = int_to_ptr.vmem [resolvable:$true] %s71_s22 }
  0x16   :  { %s95_s23 = sshll.u32 %s1544_s2, 4  ;;  %s1356_s24 = scalar_lea.vmem %s72_s22, 16  ;;  %s96_s23 = int_to_ptr.vmem [resolvable:$true] %s95_s23 }
  0x17   :  { %p1357_p5 = scmp.ne.s32.totalorder %s72_s22, %s1356_s24  ;;  %s1360_s25 = scalar_lea.vmem %s72_s22, 32 }
  0x18   :  { %p1361_p6 = scmp.lt.s32.totalorder %s72_s22, %s72_s22  ;;  %p1362_p7 = scmp.lt.s32.totalorder %s1360_s25, %s1356_s24 }
  0x1a   :  { %52 = dma.hbm_to_vmem [thread:$0]  %s1914_s20, 512, %s47_s28, [#allocation6], %s1541_s30, %s1541_s30, %s1542_s0  }
  0x1b   :  { %p1363_p8 = por %p1362_p7, %p1361_p6 }
  0x1d   :  { %p1364_p9 = pnand %p1363_p8, %p1357_p5 }
  0x1f   :  { %1367 = shalt.err (!%p1364_p9)
}
  0x20   :  { %74 = dma.hbm_to_vmem [thread:$0]  %s1897_s5, 16, %s72_s22, [#allocation9]  }
  0x21   :  { %s1376_s29 = scalar_lea.vmem %s96_s23, 16  ;;  %s1380_s28 = scalar_lea.vmem %s96_s23, 32 }
  0x22   :  { %p1377_p10 = scmp.ne.s32.totalorder %s96_s23, %s1376_s29  ;;  %p1381_p11 = scmp.lt.s32.totalorder %s96_s23, %s96_s23 }
  0x23   :  { %p1382_p12 = scmp.lt.s32.totalorder %s1380_s28, %s1376_s29 }
  0x25   :  { %p1383_p13 = por %p1382_p12, %p1381_p11 }
  0x27   :  { %p1384_p0 = pnand %p1383_p13, %p1377_p10 }
  0x29   :  { %1387 = shalt.err (!%p1384_p0)
}
  0x2a   :  { %98 = dma.hbm_to_vmem [thread:$0]  %s1901_s9, 16, %s96_s23, [#allocation12]  }
  0x2b   :  { %s1545_s20 = smov [#allocation14]   ;;  %s1546_s2 = smov [#allocation2]  }
  0x2c   :  { %s117_s21 = sshll.u32 %s1545_s20, 4  ;;  %s37_s24 = sshll.u32 %s1546_s2, 4  ;;  %s118_s21 = int_to_ptr.vmem [resolvable:$true] %s117_s21  ;;  %s38_s24 = int_to_ptr.vmem [resolvable:$true] %s37_s24 }
  0x2d   :  { %s1396_s25 = scalar_lea.vmem %s118_s21, 16  ;;  %s1400_s5 = scalar_lea.vmem %s118_s21, 32 }
  0x2e   :  { %p1397_p1 = scmp.ne.s32.totalorder %s118_s21, %s1396_s25  ;;  %p1401_p2 = scmp.lt.s32.totalorder %s118_s21, %s118_s21 }
  0x2f   :  { %p1402_p3 = scmp.lt.s32.totalorder %s1400_s5, %s1396_s25 }
  0x31   :  { %p1403_p4 = por %p1402_p3, %p1401_p2 }
  0x33   :  { %p1404_p5 = pnand %p1403_p4, %p1397_p1 }
  0x35   :  { %1407 = shalt.err (!%p1404_p5)
}
  0x36   :  { %120 = dma.hbm_to_vmem [thread:$0]  %s1903_s11, 16, %s118_s21, [#allocation15]  }
  0x37   :  { %s1416_s27 = scalar_lea.vmem %s38_s24, 32  ;;  %p1421_p7 = scmp.lt.s32.totalorder %s38_s24, %s38_s24 }
  0x38   :  { %p1417_p6 = scmp.ne.s32.totalorder %s38_s24, %s1416_s27  ;;  %p1422_p8 = scmp.lt.s32.totalorder %s1416_s27, %s1416_s27 }
  0x3a   :  { %p1423_p9 = por %p1422_p8, %p1421_p7 }
  0x3c   :  { %p1424_p10 = pnand %p1423_p9, %p1417_p6 }
  0x3e   :  { %1427 = shalt.err (!%p1424_p10)
}
  0x3f   :  { %s1915_s29 = sld [smem:[#allocation25_spill]]  ;;  %s1547_s28 = smov [#allocation7]  }
  0x40   :  { %s59_s19 = sshll.u32 %s1547_s28, 4  ;;  %s1548_s1 = smov [#allocation10]   ;;  %s60_s19 = int_to_ptr.vmem [resolvable:$true] %s59_s19 }
  0x41   :  { %s83_s20 = sshll.u32 %s1548_s1, 4  ;;  %s1436_s2 = scalar_lea.vmem %s60_s19, 16  ;;  %s84_s20 = int_to_ptr.vmem [resolvable:$true] %s83_s20 }
  0x42   :  { %p1437_p11 = scmp.ne.s32.totalorder %s60_s19, %s1436_s2  ;;  %s1440_s11 = scalar_lea.vmem %s60_s19, 32 }
  0x43   :  { %p1441_p12 = scmp.lt.s32.totalorder %s60_s19, %s60_s19  ;;  %p1442_p13 = scmp.lt.s32.totalorder %s1440_s11, %s1436_s2 }
  0x45   :  { %40 = dma.hbm_to_vmem [thread:$0]  %s1915_s29, 32, %s38_s24, [#allocation3]  }
  0x46   :  { %p1443_p0 = por %p1442_p13, %p1441_p12 }
  0x48   :  { %p1444_p1 = pnand %p1443_p0, %p1437_p11 }
  0x4a   :  { %1447 = shalt.err (!%p1444_p1)
}
  0x4b   :  { %62 = dma.hbm_to_vmem [thread:$0]  %s1895_s3, 16, %s60_s19, [#allocation6]  }
  0x4c   :  { %s1456_s5 = scalar_lea.vmem %s84_s20, 16  ;;  %s1460_s24 = scalar_lea.vmem %s84_s20, 32 }
  0x4d   :  { %p1457_p2 = scmp.ne.s32.totalorder %s84_s20, %s1456_s5  ;;  %p1461_p3 = scmp.lt.s32.totalorder %s84_s20, %s84_s20 }
  0x4e   :  { %p1462_p4 = scmp.lt.s32.totalorder %s1460_s24, %s1456_s5 }
  0x50   :  { %p1463_p5 = por %p1462_p4, %p1461_p3 }
  0x52   :  { %p1464_p6 = pnand %p1463_p5, %p1457_p2 }
  0x54   :  { %1467 = shalt.err (!%p1464_p6)
}
  0x55   :  { %86 = dma.hbm_to_vmem [thread:$0]  %s1899_s7, 16, %s84_s20, [#allocation9]  }
  0x56   :  { %s1549_s27 = smov [#allocation13]   ;;  %s1550_s23 = smov [#allocation16]  }
  0x57   :  { %s104_s9 = sshll.u32 %s1549_s27, 4  ;;  %s130_s29 = sshll.u32 %s1550_s23, 4  ;;  %s105_s9 = int_to_ptr.vmem [resolvable:$true] %s104_s9  ;;  %s131_s29 = int_to_ptr.vmem [resolvable:$true] %s130_s29 }
  0x58   :  { %s1476_s28 = scalar_lea.vmem %s105_s9, 256  ;;  %p1481_p8 = scmp.lt.s32.totalorder %s105_s9, %s105_s9 }
  0x59   :  { %p1477_p7 = scmp.ne.s32.totalorder %s105_s9, %s1476_s28  ;;  %p1482_p9 = scmp.lt.s32.totalorder %s1476_s28, %s1476_s28 }
  0x5b   :  { %p1483_p10 = por %p1482_p9, %p1481_p8 }
  0x5d   :  { %p1484_p11 = pnand %p1483_p10, %p1477_p7 }
  0x5f   :  { %1487 = shalt.err (!%p1484_p11)
}
  0x60   :  { %110 = dma.hbm_to_vmem [thread:$0]  %s1902_s10, 256, %s105_s9, [#allocation12], %s1541_s30, %s1541_s30, %s1542_s0  }
  0x61   :  { %s1496_s7 = scalar_lea.vmem %s131_s29, 1024  ;;  %p1501_p13 = scmp.lt.s32.totalorder %s131_s29, %s131_s29 }
  0x62   :  { %p1497_p12 = scmp.ne.s32.totalorder %s131_s29, %s1496_s7  ;;  %p1502_p0 = scmp.lt.s32.totalorder %s1496_s7, %s1496_s7 }
  0x64   :  { %p1503_p1 = por %p1502_p0, %p1501_p13 }
  0x66   :  { %p1504_p2 = pnand %p1503_p1, %p1497_p12 }
  0x68   :  { %1507 = shalt.err (!%p1504_p2)
}
  0x69   :  { %136 = dma.hbm_to_vmem [thread:$0]  %s1906_s14, 1024, %s131_s29, [#allocation15], %s1541_s30, %s1541_s30, %s1542_s0  }
  0x6a   :  { %1528 = dma.done.wait [#allocation3], 32  }
  0x6b   :  { %1529 = vsyncadd [#allocation3], 4294967264 }
  0x6c   :  { %1530 = dma.done.wait [#allocation6], 528  }
  0x6d   :  { %1531 = vsyncadd [#allocation6], 4294966768 }
  0x6e   :  { %1532 = dma.done.wait [#allocation9], 32  }
  0x6f   :  { %1533 = vsyncadd [#allocation9], 4294967264 }
  0x70   :  { %1534 = dma.done.wait [#allocation12], 272  }
  0x71   :  { %1535 = vsyncadd [#allocation12], 4294967024 }
  0x72   :  { %1536 = dma.done.wait [#allocation15], 1040  }
  0x73   :  { %1537 = vsyncadd [#allocation15], 4294966256  ;;  %v1551_v0 = vmov 0.0   ;;  %vm1552_vm0 = vmmov 0   ;;  %v173_v1 = vld [vmem:[#allocation5 + $0x18] sm:$0xff]  ;;  %v172_v2 = vld [vmem:[#allocation5 + $0x10] sm:$0xff] }
  0x74   :  { %1170 = vmatprep.subr.mxu1 %v1551_v0  ;;  %1178 = vmatprep.mubr.msk.f32.mxu1 %vm1552_vm0, %v1551_v0  ;;  %v233_v3 = vld [vmem:[#allocation2] sm:$0x3]  ;;  %v171_v4 = vld [vmem:[#allocation5 + $0x8] sm:$0xff]  ;;  %s1916_s2 = sld [smem:[#allocation24_spill]]  ;;  %vm237_vm1 = vcmask 1041408   ;;  %v170_v7 = vld [vmem:[#allocation5] sm:$0xff] }
  0x75   :  { %1200 = vmatprep.subr.mxu0 %v1551_v0  ;;  %1216 = vmatprep.mubr.msk.f32.mxu0 %vm1552_vm0, %v1551_v0  ;;  %v235_v6 = vrot.slane %v233_v3, 6  ;;  %vm245_vm2 = vcmask 261120   ;;  %v182_v9 = vld [vmem:[%s1896_s4 + $0x38] sm:$0xff]  ;;  %v181_v10 = vld [vmem:[%s1896_s4 + $0x30] sm:$0xff]  ;;  %v180_v11 = vld [vmem:[%s1896_s4 + $0x28] sm:$0xff]  ;;  %vm326_vm3 = vcmask 523264  }
  0x76   :  { %1171 = vmatpush3.msra.mxu1 %v173_v1  ;;  %v179_v12 = vld [vmem:[%s1896_s4 + $0x20] sm:$0xff]  ;;  %v178_v13 = vld [vmem:[%s1896_s4 + $0x18] sm:$0xff]  ;;  %v177_v14 = vld [vmem:[%s1896_s4 + $0x10] sm:$0xff]  ;;  %vm608_vm4 = vcmask 1043456   ;;  %vm610_vm5 = vcmask 1045504   ;;  %vm624_vm6 = vcmask 130048  }
  0x77   :  { %1172 = vmatprep.subr.mxu1 %v1551_v0  ;;  %v176_v15 = vld [vmem:[%s1896_s4 + $0x8] sm:$0xff]  ;;  %v175_v16 = vld [vmem:[%s1896_s4] sm:$0xff]  ;;  %v191_v17 = vld [vmem:[%s1898_s6 + $0x38] sm:$0xff]  ;;  %vm1045_vm7 = vcmask 257024   ;;  %s1553_s1 = smov [#allocation17]  }
  0x78   :  { %1173 = vmatpush3.msra.mxu1 %v172_v2  ;;  %v190_v18 = vld [vmem:[%s1898_s6 + $0x30] sm:$0xff]  ;;  %1201 = vmatpush3.msra.mxu0 %v191_v17  ;;  %v189_v19 = vld [vmem:[%s1898_s6 + $0x28] sm:$0xff]  ;;  %v188_v20 = vld [vmem:[%s1898_s6 + $0x20] sm:$0xff]  ;;  %s1052_s20 = sshll.u32 %s1553_s1, 4  ;;  %s1053_s20 = int_to_ptr.vmem [resolvable:$true] %s1052_s20 }
  0x79   :  { %1174 = vmatprep.subr.mxu1 %v1551_v0  ;;  %1202 = vmatprep.subr.mxu0 %v1551_v0  ;;  %v187_v21 = vld [vmem:[%s1898_s6 + $0x18] sm:$0xff]  ;;  %v1068_v22 = vld [vmem:[#allocation7] ss:$0 sm:$0xff]  ;;  %v186_v27 = vld [vmem:[%s1898_s6 + $0x10] sm:$0xff]  ;;  %p1513_p4 = scmp.lt.s32.totalorder %s1053_s20, %s1053_s20 }
  0x7a   :  { %v232_v5 = vld [vmem:[%s1916_s2] sm:$0x3]  ;;  %1175 = vmatpush3.msra.mxu1 %v171_v4  ;;  %1203 = vmatpush3.msra.mxu0 %v190_v18  ;;  %v185_v28 = vld [vmem:[%s1898_s6 + $0x8] sm:$0xff]  ;;  %v200_v30 = vld [vmem:[%s1900_s8 + $0x38] sm:$0xff] }
  0x7b   :  { %v238_v8 = vsel %vm237_vm1, %v232_v5, %v235_v6  ;;  %1176 = vmatprep.subr.mxu1 %v1551_v0  ;;  %1204 = vmatprep.subr.mxu0 %v1551_v0  ;;  %v184_v29 = vld [vmem:[%s1898_s6] sm:$0xff]  ;;  %v199_v31 = vld [vmem:[%s1900_s8 + $0x30] sm:$0xff]  ;;  %v198_v32 = vld [vmem:[%s1900_s8 + $0x28] sm:$0xff] }
  0x7c   :  { %1177 = vmatpush3.msra.mxu1 %v170_v7  ;;  %1205 = vmatpush3.msra.mxu0 %v189_v19  ;;  %v197_v33 = vld [vmem:[%s1900_s8 + $0x20] sm:$0xff]  ;;  %v196_v34 = vld [vmem:[%s1900_s8 + $0x18] sm:$0xff]  ;;  %v195_v40 = vld [vmem:[%s1900_s8 + $0x10] sm:$0xff] }
  0x7d   :  { %1179 = vmatmul.mubr.msk.f32.vlgmr.msra.gmra.mxu1 %vm245_vm2, %v238_v8  ;;  %1181 = vmatprep.subr.mxu1 %v1551_v0  ;;  %v1070_v35 = vld [vmem:[#allocation8] ss:$0 sm:$0xff]  ;;  %v194_v41 = vld [vmem:[%s1900_s8 + $0x8] sm:$0xff]  ;;  %v1072_v43 = vld [vmem:[#allocation10] ss:$0 sm:$0xff] }
  0x7e   :  { %1182 = vmatpush3.msra.mxu1 %v182_v9  ;;  %1197 = vmatprep.mubr.msk.f32.mxu1 %vm1552_vm0, %v1551_v0  ;;  %v193_v42 = vld [vmem:[%s1900_s8] sm:$0xff]  ;;  %v203_v48 = vld [vmem:[#allocation13 + $0x8] sm:$0xff]  ;;  %v202_v49 = vld [vmem:[#allocation13] sm:$0xff] }
  0x7f   :  { %1183 = vmatprep.subr.mxu1 %v1551_v0  ;;  %1206 = vmatprep.subr.mxu0 %v1551_v0  ;;  %v212_v50 = vld [vmem:[%s1904_s12 + $0x38] sm:$0xff]  ;;  %v1074_v51 = vld [vmem:[#allocation11] ss:$0 sm:$0xff] }
  0x80   :  { %1184 = vmatpush3.msra.mxu1 %v181_v10  ;;  %1207 = vmatpush3.msra.mxu0 %v188_v20 }
  0x81   :  { %1185 = vmatprep.subr.mxu1 %v1551_v0  ;;  %1208 = vmatprep.subr.mxu0 %v1551_v0 }
  0x82   :  { %1186 = vmatpush3.msra.mxu1 %v180_v11  ;;  %1209 = vmatpush3.msra.mxu0 %v187_v21 }
  0x83   :  { %1187 = vmatprep.subr.mxu1 %v1551_v0  ;;  %1210 = vmatprep.subr.mxu0 %v1551_v0 }
  0x84   :  { %1188 = vmatpush3.msra.mxu1 %v179_v12  ;;  %1211 = vmatpush3.msra.mxu0 %v186_v27  ;;  %v211_v27 = vld [vmem:[%s1904_s12 + $0x30] sm:$0xff] }
  0x85   :  { %1189 = vmatprep.subr.mxu1 %v1551_v0  ;;  %1212 = vmatprep.subr.mxu0 %v1551_v0 }
  0x86   :  { %1190 = vmatpush3.msra.mxu1 %v178_v13  ;;  %1213 = vmatpush3.msra.mxu0 %v185_v28 }
  0x87   :  { %1191 = vmatprep.subr.mxu1 %v1551_v0  ;;  %1214 = vmatprep.subr.mxu0 %v1551_v0 }
  0x88   :  { %1192 = vmatpush3.msra.mxu1 %v177_v14  ;;  %1215 = vmatpush3.msra.mxu0 %v184_v29  ;;  %v210_v29 = vld [vmem:[%s1904_s12 + $0x28] sm:$0xff] }
  0x89   :  { %1193 = vmatprep.subr.mxu1 %v1551_v0  ;;  %1238 = vmatprep.subr.mxu0 %v203_v48 }
  0x8a   :  { %1194 = vmatpush3.msra.mxu1 %v176_v15 }
  0x8b   :  { %1195 = vmatprep.subr.mxu1 %v1551_v0 }
  0x8c   :  { %1196 = vmatpush3.msra.mxu1 %v175_v16 }
  0x8d   :  { %1219 = vmatprep.subr.mxu1 %v1551_v0 }
 0x13d   :  { %v315_v23 = vpop.f32.mrf.mxu1 }
 0x13e   :  { %v316_v24 = vadd.f32 %v1068_v22, %v315_v23 }
 0x13f   :  { %v1180_v25 = vpop.f32.mrf.mxu1 }
 0x140   :  { %v319_v26 = vmax.f32 %v316_v24, 0.0 }
 0x142   :  { %1198 = vmatmul.mubr.msk.f32.vlgmr.msra.gmra.mxu1 %vm326_vm3, %v319_v26 }
 0x143   :  { %1235 = vmatprep.mubr.msk.f32.mxu1 %vm1552_vm0, %v1551_v0  ;;  %1220 = vmatpush3.msra.mxu1 %v200_v30  ;;  %v209_v30 = vld [vmem:[%s1904_s12 + $0x20] sm:$0xff] }
 0x144   :  { %1221 = vmatprep.subr.mxu1 %v1551_v0 }
 0x145   :  { %1222 = vmatpush3.msra.mxu1 %v199_v31  ;;  %v208_v31 = vld [vmem:[%s1904_s12 + $0x18] sm:$0xff] }
 0x146   :  { %1223 = vmatprep.subr.mxu1 %v1551_v0 }
 0x147   :  { %1224 = vmatpush3.msra.mxu1 %v198_v32  ;;  %v207_v32 = vld [vmem:[%s1904_s12 + $0x10] sm:$0xff] }
 0x148   :  { %1225 = vmatprep.subr.mxu1 %v1551_v0 }
 0x149   :  { %1226 = vmatpush3.msra.mxu1 %v197_v33  ;;  %v206_v33 = vld [vmem:[%s1904_s12 + $0x8] sm:$0xff] }
 0x14a   :  { %1227 = vmatprep.subr.mxu1 %v1551_v0 }
 0x14b   :  { %1228 = vmatpush3.msra.mxu1 %v196_v34  ;;  %v205_v34 = vld [vmem:[%s1904_s12] sm:$0xff] }
 0x14c   :  { %1229 = vmatprep.subr.mxu1 %v1551_v0 }
 0x14d   :  { %1230 = vmatpush3.msra.mxu1 %v195_v40 }
 0x14e   :  { %1231 = vmatprep.subr.mxu1 %v1551_v0 }
 0x14f   :  { %1232 = vmatpush3.msra.mxu1 %v194_v41 }
 0x150   :  { %1233 = vmatprep.subr.mxu1 %v1551_v0 }
 0x151   :  { %1234 = vmatpush3.msra.mxu1 %v193_v42 }
 0x202   :  { %v396_v36 = vpop.f32.mrf.mxu1 }
 0x203   :  { %v397_v37 = vadd.f32 %v1070_v35, %v396_v36  ;;  %v221_v35 = vld [vmem:[#allocation16 + $0x38] sm:$0xff]  ;;  %v220_v36 = vld [vmem:[#allocation16 + $0x30] sm:$0xff] }
 0x204   :  { %v1199_v38 = vpop.f32.mrf.mxu1  ;;  %1270 = vmatprep.subr.mxu1 %v221_v35 }
 0x205   :  { %v400_v39 = vmax.f32 %v397_v37, 0.0  ;;  %v219_v37 = vld [vmem:[#allocation16 + $0x28] sm:$0xff]  ;;  %v218_v38 = vld [vmem:[#allocation16 + $0x20] sm:$0xff] }
 0x207   :  { %1217 = vmatmul.mubr.msk.f32.vlgmr.msra.gmra.mxu0 %vm326_vm3, %v400_v39  ;;  %v1076_v39 = vld [vmem:[#allocation14] ss:$0 sm:$0xff] }
 0x208   :  { %1239 = vmatpush3.msra.mxu0 %v203_v48 }
 0x209   :  { %1240 = vmatprep.subr.mxu0 %v202_v49 }
 0x20a   :  { %1241 = vmatpush3.msra.mxu0 %v202_v49 }
 0x20b   :  { %1248 = vmatprep.subr.mxu0 %v212_v50 }
 0x2c7   :  { %v476_v44 = vpop.f32.mrf.mxu0 }
 0x2c8   :  { %v477_v45 = vadd.f32 %v1072_v43, %v476_v44 }
 0x2c9   :  { %v1218_v46 = vpop.f32.mrf.mxu0 }
 0x2ca   :  { %v480_v47 = vmax.f32 %v477_v45, 0.0 }
 0x2cc   :  { %1236 = vmatmul.mubr.msk.f32.vlgmr.msra.gmra.mxu1 %vm326_vm3, %v480_v47 }
 0x2cd   :  { %1271 = vmatpush3.msra.mxu1 %v221_v35 }
 0x2ce   :  { %1272 = vmatprep.subr.mxu1 %v220_v36 }
 0x2cf   :  { %1273 = vmatpush3.msra.mxu1 %v220_v36 }
 0x2d0   :  { %1274 = vmatprep.subr.mxu1 %v219_v37 }
 0x2d1   :  { %1275 = vmatpush3.msra.mxu1 %v219_v37 }
 0x2d2   :  { %1276 = vmatprep.subr.mxu1 %v218_v38 }
 0x2d3   :  { %1277 = vmatpush3.msra.mxu1 %v218_v38 }
 0x38c   :  { %v556_v52 = vpop.f32.mrf.mxu1 }
 0x38d   :  { %v557_v53 = vadd.f32 %v1074_v51, %v556_v52  ;;  %v217_v52 = vld [vmem:[#allocation16 + $0x18] sm:$0xff] }
 0x38e   :  { %v1237_v54 = vpop.f32.mrf.mxu1  ;;  %1278 = vmatprep.subr.mxu1 %v217_v52 }
 0x38f   :  { %v561_v55 = vrot.slane %v557_v53, 2  ;;  %v567_v56 = vrot.slane %v557_v53, 6  ;;  %1279 = vmatpush3.msra.mxu1 %v217_v52  ;;  %v215_v54 = vld [vmem:[#allocation16 + $0x8] sm:$0xff] }
 0x391   :  { %v563_v57 = vmin.f32 %v557_v53, %v561_v55  ;;  %v565_v58 = vsub.f32 %v557_v53, %v561_v55  ;;  %v569_v59 = vsub.f32 %v557_v53, %v567_v56  ;;  %v564_v60 = vadd.f32 %v561_v55, %v557_v53 }
 0x393   :  { %v566_v61 = vmax.f32 %v565_v58, 0.0  ;;  %v570_v62 = vmax.f32 %v569_v59, 0.0  ;;  %v577_v63 = vsub.f32 %v557_v53, %v563_v57  ;;  %v580_v0 = vrot.slane %v563_v57, 6  ;;  %v228_v58 = vld [vmem:[%s1908_s16 + $0x28] sm:$0xff]  ;;  %v227_v59 = vld [vmem:[%s1908_s16 + $0x20] sm:$0xff] }
 0x394   :  { %v576_v1 = vadd.f32 %v564_v60, %v557_v53  ;;  %v575_v8 = vadd.f32 %v564_v60, %v561_v55 }
 0x395   :  { %v578_v2 = vmax.f32 %v577_v63, 0.0  ;;  %v582_v3 = vsub.f32 %v557_v53, %v580_v0  ;;  %v571_v4 = vsub.f32 %v566_v61, %v561_v55  ;;  %v573_v5 = vsub.f32 %v570_v62, %v567_v56  ;;  %v214_v55 = vld [vmem:[#allocation16] sm:$0xff] }
 0x396   :  { %v599_v6 = vrot.slane %v576_v1, 6  ;;  %v587_v15 = vrot.slane %v566_v61, 4  ;;  %v590_v18 = vrot.slane %v570_v62, 4  ;;  %v612_v20 = vsel %vm237_vm1, %v564_v60, %v580_v0  ;;  %v230_v56 = vld [vmem:[%s1908_s16 + $0x38] sm:$0xff]  ;;  %v1081_v60 = vld [vmem:[%s1905_s13] ss:$0 sm:$0xff] }
 0x397   :  { %v583_v7 = vmax.f32 %v582_v3, 0.0  ;;  %v572_v9 = vmax.f32 %v571_v4, 0.0  ;;  %v574_v10 = vmax.f32 %v573_v5, 0.0  ;;  %v602_v11 = vrot.slane %v578_v2, 4 }
 0x398   :  { %v584_v12 = vadd.f32 %v578_v2, %v563_v57  ;;  %v615_v14 = vsel %vm237_vm1, %v575_v8, %v599_v6  ;;  %v229_v57 = vld [vmem:[%s1908_s16 + $0x30] sm:$0xff] }
 0x399   :  { %v585_v13 = vadd.f32 %v583_v7, %v580_v0  ;;  %v593_v16 = vrot.slane %v572_v9, 4  ;;  %v596_v17 = vrot.slane %v574_v10, 4  ;;  %v605_v21 = vrot.slane %v583_v7, 4  ;;  %v226_v9 = vld [vmem:[%s1908_s16 + $0x18] sm:$0xff]  ;;  %v225_v10 = vld [vmem:[%s1908_s16 + $0x10] sm:$0xff] }
 0x39a   :  { %v616_v24 = vsel %vm608_vm4, %v615_v14, %v602_v11  ;;  %v224_v11 = vld [vmem:[%s1908_s16 + $0x8] sm:$0xff] }
 0x39b   :  { %v607_v19 = vsel %vm237_vm1, %v584_v12, %v585_v13  ;;  %v613_v23 = vsel %vm608_vm4, %v612_v20, %v593_v16  ;;  %v617_v28 = vsel %vm610_vm5, %v616_v24, %v605_v21  ;;  %v223_v12 = vld [vmem:[%s1908_s16] sm:$0xff] }
 0x39c   :  { %v609_v22 = vsel %vm608_vm4, %v607_v19, %v587_v15  ;;  %v614_v26 = vsel %vm610_vm5, %v613_v23, %v596_v17  ;;  %v1086_v13 = vld [vmem:[%s1907_s15] ss:$0 sm:$0xff] }
 0x39d   :  { %v611_v25 = vsel %vm610_vm5, %v609_v22, %v590_v18 }
 0x39e   :  { %1242 = vmatprep.mubr.msk.f32.mxu0 %vm624_vm6, %v611_v25 }
 0x39f   :  { %1243 = vmatmul.mubr.msk.f32.vlgmr.msra.gmra.mxu0 %vm624_vm6, %v614_v26  ;;  %v1091_v26 = vld [vmem:[%s1909_s17] ss:$0 sm:$0xff]  ;;  %s1508_s17 = scalar_lea.vmem %s1053_s20, 512 }
 0x3a0   :  { %1245 = vmatprep.mubr.msk.f32.mxu0 %vm624_vm6, %v617_v28  ;;  %1249 = vmatpush3.msra.mxu0 %v212_v50  ;;  %p1509_p3 = scmp.ne.s32.totalorder %s1053_s20, %s1508_s17  ;;  %p1514_p5 = scmp.lt.s32.totalorder %s1508_s17, %s1508_s17 }
 0x3a1   :  { %1250 = vmatprep.subr.mxu0 %v211_v27 }
 0x3a2   :  { %1251 = vmatpush3.msra.mxu0 %v211_v27  ;;  %p1515_p6 = por %p1514_p5, %p1513_p4 }
 0x3a3   :  { %1246 = vmatmul.mubr.msk.f32.gmra.mxu0 %vm624_vm6, %v557_v53  ;;  %1252 = vmatprep.subr.mxu0 %v210_v29  ;;  %v216_v53 = vld [vmem:[#allocation16 + $0x10] sm:$0xff] }
 0x3a4   :  { %1253 = vmatpush3.msra.mxu0 %v210_v29  ;;  %1280 = vmatprep.subr.mxu1 %v216_v53  ;;  %p1516_p7 = pnand %p1515_p6, %p1509_p3 }
 0x3a5   :  { %1254 = vmatprep.subr.mxu0 %v209_v30  ;;  %1281 = vmatpush3.msra.mxu1 %v216_v53 }
 0x3a6   :  { %1255 = vmatpush3.msra.mxu0 %v209_v30  ;;  %1282 = vmatprep.subr.mxu1 %v215_v54 }
 0x3a7   :  { %1256 = vmatprep.subr.mxu0 %v208_v31  ;;  %1283 = vmatpush3.msra.mxu1 %v215_v54 }
 0x3a8   :  { %1257 = vmatpush3.msra.mxu0 %v208_v31  ;;  %1284 = vmatprep.subr.mxu1 %v214_v55 }
 0x3a9   :  { %1258 = vmatprep.subr.mxu0 %v207_v32  ;;  %1285 = vmatpush3.msra.mxu1 %v214_v55 }
 0x3aa   :  { %1259 = vmatpush3.msra.mxu0 %v207_v32 }
 0x3ab   :  { %1260 = vmatprep.subr.mxu0 %v206_v33 }
 0x3ac   :  { %1261 = vmatpush3.msra.mxu0 %v206_v33 }
 0x3ad   :  { %1262 = vmatprep.subr.mxu0 %v205_v34 }
 0x3ae   :  { %1263 = vmatpush3.msra.mxu0 %v205_v34 }
 0x3af   :  { %1292 = vmatprep.subr.mxu0 %v230_v56 }
 0x45f   :  { %v1244_v40 = vpop.f32.mrf.mxu0 }
 0x460   :  { %v708_v41 = vadd.f32 %v1244_v40, %v1076_v39 }
 0x461   :  { %v702_v42 = vpop.f32.mrf.mxu0 }
 0x462   :  { %v703_v43 = vadd.f32 %v1076_v39, %v702_v42  ;;  %v722_v46 = vmax.f32 %v708_v41, 0.0 }
 0x463   :  { %v1247_v44 = vpop.f32.mrf.mxu0 }
 0x464   :  { %v721_v45 = vmax.f32 %v703_v43, 0.0  ;;  %v718_v47 = vadd.f32 %v1247_v44, %v1076_v39 }
 0x465   :  { %v712_v48 = vpop.f32.mrf.mxu0 }
 0x466   :  { %v713_v49 = vadd.f32 %v1076_v39, %v712_v48  ;;  %1264 = vmatprep.mubr.msk.f32.mxu0 %vm326_vm3, %v721_v45  ;;  %v724_v51 = vmax.f32 %v718_v47, 0.0 }
 0x467   :  { %1265 = vmatmul.mubr.msk.f32.vlgmr.msra.gmra.mxu0 %vm326_vm3, %v722_v46 }
 0x468   :  { %v723_v50 = vmax.f32 %v713_v49, 0.0  ;;  %1293 = vmatpush3.msra.mxu0 %v230_v56 }
 0x469   :  { %1294 = vmatprep.subr.mxu0 %v229_v57 }
 0x46a   :  { %1267 = vmatprep.mubr.msk.f32.mxu0 %vm326_vm3, %v723_v50  ;;  %1295 = vmatpush3.msra.mxu0 %v229_v57 }
 0x46b   :  { %1268 = vmatmul.mubr.msk.f32.gmra.mxu0 %vm326_vm3, %v724_v51  ;;  %1296 = vmatprep.subr.mxu0 %v228_v58 }
 0x46c   :  { %1297 = vmatpush3.msra.mxu0 %v228_v58 }
 0x46d   :  { %1298 = vmatprep.subr.mxu0 %v227_v59 }
 0x46e   :  { %1299 = vmatpush3.msra.mxu0 %v227_v59 }
 0x46f   :  { %1300 = vmatprep.subr.mxu0 %v226_v9 }
 0x470   :  { %1301 = vmatpush3.msra.mxu0 %v226_v9 }
 0x471   :  { %1302 = vmatprep.subr.mxu0 %v225_v10 }
 0x472   :  { %1303 = vmatpush3.msra.mxu0 %v225_v10 }
 0x473   :  { %1304 = vmatprep.subr.mxu0 %v224_v11 }
 0x474   :  { %1305 = vmatpush3.msra.mxu0 %v224_v11 }
 0x475   :  { %1306 = vmatprep.subr.mxu0 %v223_v12 }
 0x476   :  { %1307 = vmatpush3.msra.mxu0 %v223_v12 }
 0x527   :  { %v1266_v61 = vpop.f32.mrf.mxu0 }
 0x528   :  { %v815_v62 = vadd.f32 %v1266_v61, %v1081_v60 }
 0x529   :  { %v809_v63 = vpop.f32.mrf.mxu0 }
 0x52a   :  { %v810_v0 = vadd.f32 %v1081_v60, %v809_v63  ;;  %v829_v3 = vmax.f32 %v815_v62, 0.0 }
 0x52b   :  { %v1269_v1 = vpop.f32.mrf.mxu0 }
 0x52c   :  { %v828_v2 = vmax.f32 %v810_v0, 0.0  ;;  %v825_v4 = vadd.f32 %v1269_v1, %v1081_v60 }
 0x52d   :  { %v819_v5 = vpop.f32.mrf.mxu0 }
 0x52e   :  { %v820_v6 = vadd.f32 %v1081_v60, %v819_v5  ;;  %1286 = vmatprep.mubr.msk.f32.mxu1 %vm326_vm3, %v828_v2  ;;  %v831_v8 = vmax.f32 %v825_v4, 0.0 }
 0x52f   :  { %1287 = vmatmul.mubr.msk.f32.vlgmr.msra.gmra.mxu1 %vm326_vm3, %v829_v3 }
 0x530   :  { %v830_v7 = vmax.f32 %v820_v6, 0.0 }
 0x532   :  { %1289 = vmatprep.mubr.msk.f32.mxu1 %vm326_vm3, %v830_v7 }
 0x533   :  { %1290 = vmatmul.mubr.msk.f32.gmra.mxu1 %vm326_vm3, %v831_v8 }
 0x5ef   :  { %v1288_v14 = vpop.f32.mrf.mxu1 }
 0x5f0   :  { %v922_v15 = vadd.f32 %v1288_v14, %v1086_v13 }
 0x5f1   :  { %v916_v16 = vpop.f32.mrf.mxu1 }
 0x5f2   :  { %v917_v17 = vadd.f32 %v1086_v13, %v916_v16  ;;  %v936_v20 = vmax.f32 %v922_v15, 0.0 }
 0x5f3   :  { %v1291_v18 = vpop.f32.mrf.mxu1 }
 0x5f4   :  { %v935_v19 = vmax.f32 %v917_v17, 0.0  ;;  %v932_v21 = vadd.f32 %v1291_v18, %v1086_v13 }
 0x5f5   :  { %v926_v22 = vpop.f32.mrf.mxu1 }
 0x5f6   :  { %v927_v23 = vadd.f32 %v1086_v13, %v926_v22  ;;  %1308 = vmatprep.mubr.msk.f32.mxu0 %vm326_vm3, %v935_v19  ;;  %v938_v25 = vmax.f32 %v932_v21, 0.0 }
 0x5f7   :  { %1309 = vmatmul.mubr.msk.f32.vlgmr.msra.gmra.mxu0 %vm326_vm3, %v936_v20 }
 0x5f8   :  { %v937_v24 = vmax.f32 %v927_v23, 0.0 }
 0x5fa   :  { %1311 = vmatprep.mubr.msk.f32.mxu0 %vm326_vm3, %v937_v24 }
 0x5fb   :  { %1312 = vmatmul.mubr.msk.f32.gmra.mxu0 %vm326_vm3, %v938_v25 }
 0x6b7   :  { %v1310_v27 = vpop.f32.mrf.mxu0 }
 0x6b8   :  { %v1029_v28 = vadd.f32 %v1310_v27, %v1091_v26 }
 0x6b9   :  { %v1023_v29 = vpop.f32.mrf.mxu0 }
 0x6ba   :  { %1043 = vst.msk [vmem:[#allocation17 + $0x8] sm:$0xff] %vm245_vm2, %v1029_v28  ;;  %v1024_v30 = vadd.f32 %v1091_v26, %v1023_v29 }
 0x6bb   :  { %v1313_v31 = vpop.f32.mrf.mxu0 }
 0x6bc   :  { %1042 = vst.msk [vmem:[#allocation17] sm:$0xff] %vm245_vm2, %v1024_v30  ;;  %v1039_v32 = vadd.f32 %v1313_v31, %v1091_v26 }
 0x6bd   :  { %v1033_v33 = vpop.f32.mrf.mxu0 }
 0x6be   :  { %1046 = vst.msk [vmem:[#allocation17 + $0x18] sm:$0xf] %vm1045_vm7, %v1039_v32  ;;  %v1034_v34 = vadd.f32 %v1091_v26, %v1033_v33 }
 0x6c0   :  { %1044 = vst.msk [vmem:[#allocation17 + $0x10] sm:$0xff] %vm245_vm2, %v1034_v34 }
 0x6c1   :  { %1519 = shalt.err (!%p1516_p7)
}
 0x6c2   :  { %1058 = dma.vmem_to_hbm [thread:$0]  %s1053_s20, 512, %s1910_s18, [#allocation4], %s1541_s30, %s1541_s30, %s1542_s0  }
 0x6c3   :  { %1538 = dma.done.wait [#allocation4], 512  }
 0x6c4   :  { %1539 = vsyncadd [#allocation4], 4294966784 }
 0x6c5   :  { %1062 = vsyncpa [#allocation3], 1 }
 0x6c6   :  { %1063 = vsyncpa [#allocation6], 1 }
 0x6c7   :  { %1064 = vsyncpa [#allocation9], 1 }
 0x6c8   :  { %1065 = vsyncpa [#allocation12], 1 }
 0x6c9   :  { %1066 = vsyncpa [#allocation15], 1 }
 0x6ca   :  { %1067 = vsyncpa [#allocation4], 1 }

</bundles_post_ra>
